<compile_context>
chip_gen: v5e
topology: v5e:2x2
jax: 0.10.0
libtpu: 0.0.40
codegen_flags: <defaults>
</compile_context>

<pallas_src>
import jax
import jax.numpy as jnp
from jax.experimental import pallas as pl
from jax.experimental.pallas import tpu as pltpu


NEGATIVE_SLOPE = 0.1


def _leaky_relu_kernel(x_ref, o_ref):
    x = x_ref[...]
    o_ref[...] = jnp.maximum(jnp.asarray(NEGATIVE_SLOPE, x.dtype) * x, x)


def _pick_lanes(n):
    # Widest lane dim (multiple of 128) dividing the flat size; prefer ones
    # that also leave a sublane-friendly row count (rows % 8 == 0).
    for lanes in (1024, 512, 256, 128):
        if n % (lanes * 8) == 0:
            return lanes, 0
    for lanes in (1024, 512, 256, 128):
        if n % lanes == 0:
            return lanes, 0
    lanes = 128
    return lanes, (-n) % lanes  # rare fallback: minimal pad to 128


def leaky_relu_pallas(x, *, target_block_bytes=4 * 1024 * 1024):
    """Elementwise LeakyReLU (slope=0.1) via Pallas, any float shape/dtype."""
    orig_shape = x.shape
    dtype = x.dtype
    n = x.size
    if n == 0:
        return x

    itemsize = jnp.dtype(dtype).itemsize
    lanes, pad = _pick_lanes(n)

    x_flat = jnp.reshape(x, (-1,))
    if pad:  # rare: flat size not a multiple of 128
        x_flat = jnp.concatenate([x_flat, jnp.zeros((pad,), dtype=dtype)])
    total = n + pad
    rows = total // lanes
    x2d = jnp.reshape(x_flat, (rows, lanes))

    # Block rows: target ~target_block_bytes per block, sublane-aligned,
    # never larger than the array's row count.
    row_bytes = lanes * itemsize
    tile_rows = min(max(1, target_block_bytes // row_bytes), rows)
    if tile_rows >= 32:
        tile_rows = (tile_rows // 32) * 32   # clean tiling for packed dtypes too
    else:
        tile_rows = max(8, (tile_rows // 8) * 8)

    block_bytes = tile_rows * row_bytes
    grid = (pl.cdiv(rows, tile_rows),)

    # Double-buffered input + output blocks, plus headroom; capped so it is
    # safe on v7x's 64 MiB physical VMEM.
    vmem_limit = int(min(96 * 1024 * 1024, 4 * block_bytes + 8 * 1024 * 1024))

    out2d = pl.pallas_call(
        _leaky_relu_kernel,
        out_shape=jax.ShapeDtypeStruct((rows, lanes), dtype),
        grid_spec=pl.GridSpec(
            grid=grid,
            in_specs=[pl.BlockSpec((tile_rows, lanes), lambda i: (i, 0))],
            out_specs=pl.BlockSpec((tile_rows, lanes), lambda i: (i, 0)),
        ),
        compiler_params=pltpu.CompilerParams(
            dimension_semantics=("parallel",),
            vmem_limit_bytes=vmem_limit,
        ),
    )(x2d)

    if pad:
        return jnp.reshape(jnp.reshape(out2d, (-1,))[:n], orig_shape)
    return jnp.reshape(out2d, orig_shape)


if __name__ == "__main__":
    key = jax.random.PRNGKey(0)
    # Small NCHW input consistent with the module's usage in AugmentCE2P.
    x = jax.random.normal(key, (2, 4, 16, 16), dtype=jnp.float32)

    out = leaky_relu_pallas(x)
    out = jax.block_until_ready(out)

    # Reference check (pure JAX).
    ref = jnp.maximum(NEGATIVE_SLOPE * x, x)
    assert out.shape == x.shape and out.dtype == x.dtype
    assert jnp.allclose(out, ref, atol=1e-6, rtol=1e-6)

    print("KERNEL_OK")
</pallas_src>

<mosaic_0001>
module attributes {stable_mosaic.version = 11 : i64} {
  func.func @_leaky_relu_kernel(%arg0: i32, %arg1: memref<8x256xf32, #tpu.memory_space<vmem>>, %arg2: memref<8x256xf32, #tpu.memory_space<vmem>>) attributes {dimension_semantics = [#tpu.dimension_semantics<parallel>], iteration_bounds = array<i64: 1>, scalar_prefetch = 0 : i64, scratch_operands = 0 : i64, tpu.core_type = #tpu.core_type<tc>, window_params = [{transform_indices = @transform_0, window_bounds = array<i64: 8, 256>}, {transform_indices = @transform_1, window_bounds = array<i64: 8, 256>}]} {
    %c0 = arith.constant 0 : index
    %c0_0 = arith.constant 0 : index
    %0 = vector.load %arg1[%c0, %c0_0] : memref<8x256xf32, #tpu.memory_space<vmem>>, vector<8x256xf32>
    %cst = arith.constant 1.000000e-01 : f32
    %1 = vector.broadcast %cst : f32 to vector<8x256xf32>
    %2 = arith.mulf %1, %0 : vector<8x256xf32>
    %3 = arith.maximumf %2, %0 : vector<8x256xf32>
    %c0_1 = arith.constant 0 : index
    %c0_2 = arith.constant 0 : index
    %4 = vector.load %arg2[%c0_1, %c0_2] : memref<8x256xf32, #tpu.memory_space<vmem>>, vector<8x256xf32>
    tpu.vector_store %arg2[%c0_1, %c0_2], %3 {strides = array<i32>} : memref<8x256xf32, #tpu.memory_space<vmem>>, vector<8x256xf32>,
    return
  }
  func.func @transform_0(%arg0: i32) -> (i32, i32) {
    %c0_i32 = arith.constant 0 : i32
    %c0_i32_0 = arith.constant 0 : i32
    return %arg0, %c0_i32 : i32, i32
  }
  func.func @transform_1(%arg0: i32) -> (i32, i32) {
    %c0_i32 = arith.constant 0 : i32
    %c0_i32_0 = arith.constant 0 : i32
    return %arg0, %c0_i32 : i32, i32
  }
}

</mosaic_0001>

<bundles_post_ra>
// kernel: tpu_custom_call.1
= control target key start
LH: loop header
LB: loop body
LE: loop exit
PB: predicated region body
PF: predicated region fallthrough
CT: control target
= control target key end

     0   :  { %6 = vsyncpa [#allocation3], 0  ;;  %s120_s0 = inlined_call_operand.hbm [shape: f32[8,256], index: 0, kind: input, shape index: {}]   ;;  %s121_s1 = inlined_call_operand.hbm [shape: f32[8,256], index: 1, kind: output, shape index: {}]  }
   0x1   :  { %7 = vsyncpa [#allocation4], 0  ;;  %s13_s8 = sshll.u32 %s120_s0, 4  ;;  %s102_s9 = smov [#allocation2]   ;;  %s14_s8 = int_to_ptr.hbm [resolvable:$true] %s13_s8 }
   0x2   :  { %s15_s10 = sshll.u32 %s102_s9, 4  ;;  %s16_s10 = int_to_ptr.vmem [resolvable:$true] %s15_s10 }
   0x3   :  { %18 = dma.hbm_to_vmem [thread:$0]  %s14_s8, 256, %s16_s10, [#allocation3]  }
   0x4   :  { %98 = dma.done.wait [#allocation3], 256  }
   0x5   :  { %99 = vsyncadd [#allocation3], 4294967040  ;;  %v23_v0 = vld [vmem:[#allocation2] sm:$0xff]  ;;  %v24_v1 = vld [vmem:[#allocation2 + $0x8] sm:$0xff]  ;;  %s103_s11 = smov [#allocation5]   ;;  %s38_s15 = sshll.u32 %s121_s1, 4  ;;  %s39_s15 = int_to_ptr.hbm [resolvable:$true] %s38_s15 }
   0x6   :  { %v25_v2 = vmul.f32 0.1, %v23_v0  ;;  %v26_v3 = vmul.f32 0.1, %v24_v1  ;;  %s36_s12 = sshll.u32 %s103_s11, 4  ;;  %s37_s12 = int_to_ptr.vmem [resolvable:$true] %s36_s12 }
   0x8   :  { %v27_v4 = vmax.f32 %v25_v2, %v23_v0  ;;  %v28_v5 = vmax.f32 %v26_v3, %v24_v1 }
   0xa   :  { %29 = vst [vmem:[#allocation5] sm:$0xff] %v27_v4 }
   0xb   :  { %30 = vst [vmem:[#allocation5 + $0x8] sm:$0xff] %v28_v5 }
   0xc   :  { %41 = dma.vmem_to_hbm [thread:$0]  %s37_s12, 256, %s39_s15, [#allocation4]  }
   0xd   :  { %100 = dma.done.wait [#allocation4], 256  }
   0xe   :  { %101 = vsyncadd [#allocation4], 4294967040 }
   0xf   :  { %46 = vsyncpa [#allocation3], 1 }
  0x10   :  { %47 = vsyncpa [#allocation4], 1 }

</bundles_post_ra>
